<compile_context>
chip_gen: v5e
topology: v5e:2x2
jax: 0.10.0
libtpu: 0.0.40
codegen_flags: <defaults>
</compile_context>

<pallas_src>
import functools

import jax
import jax.numpy as jnp
from jax.experimental import pallas as pl
from jax.experimental.pallas import tpu as pltpu


# ----------------------------------------------------------------------------
# Model configuration (consistent with the module's __init__ contract:
# len(feat_distributions) == input_dim).
# ----------------------------------------------------------------------------
FEAT_DISTS = (
    ("gaussian", 2),
    ("gaussian", 2),
    ("bernoulli", 1),
    ("categorical", 3),
    ("bernoulli", 1),
    ("gaussian", 2),
)
INPUT_DIM = len(FEAT_DISTS)                    # 6
HIDDEN = 32
LATENT_DIM = 4
COV_DIM = sum(n for _, n in FEAT_DISTS)        # 11
BATCH = 64

LANE = 128                                     # vreg lane width

# Packed-input layout ([B, PACK_W]): x at cols 0:INPUT_DIM, eps at cols EPS_PACK_OFF:+LATENT_DIM
PACK_W = 16
EPS_PACK_OFF = 8

# Single fused output slab layout ([B, LANE])
MU_OFF = 0
LV_OFF = LATENT_DIM                            # 4
Z_OFF = 2 * LATENT_DIM                         # 8
COV_OFF = 16                                   # cov_params at cols 16:16+COV_DIM

assert EPS_PACK_OFF >= INPUT_DIM and EPS_PACK_OFF + LATENT_DIM <= PACK_W
assert Z_OFF >= 2 * LATENT_DIM and Z_OFF + LATENT_DIM <= COV_OFF
assert COV_OFF + COV_DIM <= LANE and HIDDEN <= LANE


def _build_head_layout(feat_dists, offset):
    """Compile-time column sets (already shifted by the output offset) for the decoder heads."""
    gauss_std_cols, bern_cols, cat_segments = [], [], []
    col = offset
    for dist, n in feat_dists:
        if dist == "gaussian":
            gauss_std_cols.append(col + 1)          # (mean, std)
        elif dist == "bernoulli":
            bern_cols.append(col)
        elif dist == "categorical":
            cat_segments.append((col, col + n))
        else:
            raise ValueError(f"unsupported distribution: {dist}")
        col += n
    return tuple(gauss_std_cols), tuple(bern_cols), tuple(cat_segments)


# ----------------------------------------------------------------------------
# Kernel: whole VAE forward (encoder MLP, reparameterization, decoder MLP,
# masked distribution heads).  Narrow packed input, single fused output slab.
# ----------------------------------------------------------------------------
def _vae_kernel(xe_ref,
                w1f_ref, b1f_ref, w2f_ref, b2f_ref,
                w3_ref, b3_ref, w4_ref, b4_ref,
                out_ref,
                *, gauss_std_cols, bern_cols, cat_segments, cov_off):
    xe = xe_ref[...]                                          # [TB, 16]  (x || eps, packed)

    # ---- Encoder layer 1 fused with eps lane-selection: one [TB,16]@[16,256] pass --------
    e1 = jnp.dot(xe, w1f_ref[...], preferred_element_type=jnp.float32) + b1f_ref[...]
    h = jnp.maximum(e1[:, :LANE], 0.0)                        # hidden (cols 0:HIDDEN real, rest 0)
    eps_al = e1[:, LANE:]                                     # eps at lanes Z_OFF:Z_OFF+LATENT, else 0

    # ---- Encoder layer 2 fused: [TB,128]@[128,256] ---------------------------------------
    #   first half : mu (0:4) | logvar (4:8) | mu copy (8:12)
    #   second half: logvar aligned to the z lanes (8:12)
    e2 = jnp.dot(h, w2f_ref[...], preferred_element_type=jnp.float32) + b2f_ref[...]
    enc = e2[:, :LANE]
    lv_al = e2[:, LANE:]

    # ---- Reparameterization at full vreg width (no lane shifts / slices) -----------------
    # cols 0:8 -> mu||logvar (eps_al = 0, lv_al = 0 there); cols 8:12 -> z; cols 12:128 -> 0
    z_full = enc + eps_al * jnp.exp(0.5 * lv_al)

    # ---- Decoder: Linear -> ReLU -> Linear ------------------------------------------------
    h2 = jnp.maximum(
        jnp.dot(z_full, w3_ref[...], preferred_element_type=jnp.float32) + b3_ref[...], 0.0)
    raw = jnp.dot(h2, w4_ref[...], preferred_element_type=jnp.float32) + b4_ref[...]

    # ---- Distribution heads via whole-row masked math (no cross-lane shuffles) ------------
    col = jax.lax.broadcasted_iota(jnp.int32, (1, LANE), 1)

    def col_mask(cols):
        m = jnp.zeros((1, LANE), dtype=jnp.bool_)
        for c in cols:
            m = jnp.logical_or(m, col == c)
        return m

    cov = raw                                   # gaussian means (and zero padding) pass through
    if gauss_std_cols:
        cov = jnp.where(col_mask(gauss_std_cols), jax.nn.softplus(raw), cov)
    if bern_cols:
        cov = jnp.where(col_mask(bern_cols), jax.nn.sigmoid(raw), cov)
    for start, end in cat_segments:             # segment-masked softmax per categorical feature
        seg = jnp.logical_and(col >= start, col < end)
        masked = jnp.where(seg, raw, -jnp.inf)
        m = jnp.max(masked, axis=-1, keepdims=True)
        e = jnp.exp(masked - m)                 # exactly 0 outside the segment
        s = jnp.sum(e, axis=-1, keepdims=True)
        cov = jnp.where(seg, e / s, cov)

    # ---- Single fused, lane-dense store ----------------------------------------------------
    # cols < COV_OFF come from z_full (mu | logvar | z | zeros), cols >= COV_OFF from the heads.
    out_ref[...] = jnp.where(col < cov_off, z_full, cov)


# ----------------------------------------------------------------------------
# Tile selection: largest tile <= max_batch_tile that divides B and is a
# multiple of 8; prefer >=2 tiles (v7x megacore) when the batch allows it.
# ----------------------------------------------------------------------------
def _pick_batch_tile(B, max_batch_tile=1024):
    if B % 8 != 0:
        return B                                # single full-batch tile (block == array, legal)
    TB = max(8, (min(B, max_batch_tile) // 8) * 8)
    while B % TB != 0:                          # terminates at 8 (which divides B)
        TB -= 8
    if TB == B and B >= 16 and (B // 2) % 8 == 0:
        TB = B // 2                             # >=2 grid steps: both v7x TensorCores get work
    return TB


# ----------------------------------------------------------------------------
# Wrapper
# ----------------------------------------------------------------------------
def vae_forward(x, eps, kernel_params, *, max_batch_tile=1024):
    """x: [B, INPUT_DIM] f32, eps: [B, LATENT_DIM] f32 standard-normal noise."""
    B = x.shape[0]
    TB = _pick_batch_tile(B, max_batch_tile)
    assert B % TB == 0

    # Pack x and eps into one narrow [B, 16] slab (single input DMA stream per tile).
    xe = jnp.zeros((B, PACK_W), jnp.float32)
    xe = xe.at[:, :INPUT_DIM].set(x.astype(jnp.float32))
    xe = xe.at[:, EPS_PACK_OFF:EPS_PACK_OFF + LATENT_DIM].set(eps.astype(jnp.float32))

    gauss_std_cols, bern_cols, cat_segments = _build_head_layout(FEAT_DISTS, COV_OFF)
    kernel = functools.partial(_vae_kernel,
                               gauss_std_cols=gauss_std_cols,
                               bern_cols=bern_cols,
                               cat_segments=cat_segments,
                               cov_off=COV_OFF)

    xe_spec = pl.BlockSpec((TB, PACK_W), lambda i: (i, 0))       # batch-tiled narrow input
    out_spec = pl.BlockSpec((TB, LANE), lambda i: (i, 0))        # batch-tiled fused output
    w1f_spec = pl.BlockSpec((PACK_W, 2 * LANE), lambda i: (0, 0))
    bw_spec = pl.BlockSpec((1, 2 * LANE), lambda i: (0, 0))
    w2f_spec = pl.BlockSpec((LANE, 2 * LANE), lambda i: (0, 0))
    w_spec = pl.BlockSpec((LANE, LANE), lambda i: (0, 0))
    b_spec = pl.BlockSpec((1, LANE), lambda i: (0, 0))

    out = pl.pallas_call(
        kernel,
        out_shape=jax.ShapeDtypeStruct((B, LANE), jnp.float32),
        grid=(B // TB,),
        in_specs=[xe_spec, w1f_spec, bw_spec, w2f_spec, bw_spec,
                  w_spec, b_spec, w_spec, b_spec],
        out_specs=out_spec,
        compiler_params=pltpu.CompilerParams(
            dimension_semantics=("parallel",)),   # shards batch tiles across v7x's 2 TCs
    )(xe, *kernel_params)

    mu = out[:, MU_OFF:MU_OFF + LATENT_DIM]
    logvar = out[:, LV_OFF:LV_OFF + LATENT_DIM]
    z = out[:, Z_OFF:Z_OFF + LATENT_DIM]
    cov_params = out[:, COV_OFF:COV_OFF + COV_DIM]
    return {"z": z, "cov_params": cov_params, "latent_params": (mu, logvar)}


# ----------------------------------------------------------------------------
# Parameters.  `init_raw_params` mimics torch nn.Linear init (uniform
# +-1/sqrt(fan_in)); `pack_params` produces the padded / column-offset kernel
# layout.  Re-run pack_params whenever the raw parameters change so the layout
# copies (mu / z-aligned logvar) never go stale.
# ----------------------------------------------------------------------------
def init_raw_params(key):
    def linear(key, fan_in, fan_out):
        kw, kb = jax.random.split(key)
        bound = 1.0 / jnp.sqrt(jnp.float32(fan_in))
        w = jax.random.uniform(kw, (fan_in, fan_out), jnp.float32, -bound, bound)
        b = jax.random.uniform(kb, (fan_out,), jnp.float32, -bound, bound)
        return w, b

    k1, k2, k3, k4 = jax.random.split(key, 4)
    return {
        "enc_fc1": linear(k1, INPUT_DIM, HIDDEN),                # Encoder.FC_input
        "enc_fc2": linear(k2, HIDDEN, 2 * LATENT_DIM),           # Encoder.FC_output
        "dec_fc1": linear(k3, LATENT_DIM, HIDDEN),               # Decoder.FC_hidden
        "dec_fc2": linear(k4, HIDDEN, COV_DIM),                  # Decoder.FC_output
    }


def pack_params(raw):
    w1, b1 = raw["enc_fc1"]
    w2, b2 = raw["enc_fc2"]
    w3, b3 = raw["dec_fc1"]
    w4, b4 = raw["dec_fc2"]

    # Encoder layer 1 fused with eps lane-selection: [PACK_W, 2*LANE]
    w1f = jnp.zeros((PACK_W, 2 * LANE), jnp.float32)
    w1f = w1f.at[:INPUT_DIM, :HIDDEN].set(w1)
    w1f = w1f.at[EPS_PACK_OFF:EPS_PACK_OFF + LATENT_DIM,
                 LANE + Z_OFF:LANE + Z_OFF + LATENT_DIM].set(jnp.eye(LATENT_DIM, dtype=jnp.float32))
    b1f = jnp.zeros((1, 2 * LANE), jnp.float32).at[0, :HIDDEN].set(b1)

    # Encoder layer 2 fused: mu | logvar | mu-copy in first half; z-aligned logvar in second half
    w2f = jnp.zeros((LANE, 2 * LANE), jnp.float32)
    w2f = w2f.at[:HIDDEN, MU_OFF:MU_OFF + LATENT_DIM].set(w2[:, :LATENT_DIM])
    w2f = w2f.at[:HIDDEN, LV_OFF:LV_OFF + LATENT_DIM].set(w2[:, LATENT_DIM:])
    w2f = w2f.at[:HIDDEN, Z_OFF:Z_OFF + LATENT_DIM].set(w2[:, :LATENT_DIM])          # mu copy
    w2f = w2f.at[:HIDDEN, LANE + Z_OFF:LANE + Z_OFF + LATENT_DIM].set(w2[:, LATENT_DIM:])
    b2f = jnp.zeros((1, 2 * LANE), jnp.float32)
    b2f = b2f.at[0, MU_OFF:MU_OFF + LATENT_DIM].set(b2[:LATENT_DIM])
    b2f = b2f.at[0, LV_OFF:LV_OFF + LATENT_DIM].set(b2[LATENT_DIM:])
    b2f = b2f.at[0, Z_OFF:Z_OFF + LATENT_DIM].set(b2[:LATENT_DIM])
    b2f = b2f.at[0, LANE + Z_OFF:LANE + Z_OFF + LATENT_DIM].set(b2[LATENT_DIM:])

    # Decoder layer 1: z lives at lanes Z_OFF:Z_OFF+LATENT of z_full (all other rows zero)
    w3p = jnp.zeros((LANE, LANE), jnp.float32).at[Z_OFF:Z_OFF + LATENT_DIM, :HIDDEN].set(w3)
    b3p = jnp.zeros((1, LANE), jnp.float32).at[0, :HIDDEN].set(b3)

    # Decoder layer 2: cov logits placed at lanes COV_OFF:COV_OFF+COV_DIM
    w4p = jnp.zeros((LANE, LANE), jnp.float32).at[:HIDDEN, COV_OFF:COV_OFF + COV_DIM].set(w4)
    b4p = jnp.zeros((1, LANE), jnp.float32).at[0, COV_OFF:COV_OFF + COV_DIM].set(b4)

    return (w1f, b1f, w2f, b2f, w3p, b3p, w4p, b4p)


# ----------------------------------------------------------------------------
# Pure-JAX reference (same math, raw unpadded params) for correctness check.
# ----------------------------------------------------------------------------
def vae_forward_ref(x, eps, raw):
    w1, b1 = raw["enc_fc1"]
    w2, b2 = raw["enc_fc2"]
    w3, b3 = raw["dec_fc1"]
    w4, b4 = raw["dec_fc2"]

    h = jax.nn.relu(x @ w1 + b1)
    lat = h @ w2 + b2
    mu, logvar = lat[:, :LATENT_DIM], lat[:, LATENT_DIM:]
    z = mu + eps * jnp.exp(0.5 * logvar)
    h2 = jax.nn.relu(z @ w3 + b3)
    raw_out = h2 @ w4 + b4

    segs, col = [], 0
    for dist, n in FEAT_DISTS:
        s = raw_out[:, col:col + n]
        if dist == "gaussian":
            s = jnp.concatenate([s[:, 0:1], jax.nn.softplus(s[:, 1:2])], axis=-1)
        elif dist == "bernoulli":
            s = jax.nn.sigmoid(s)
        else:
            s = jax.nn.softmax(s, axis=-1)
        segs.append(s)
        col += n
    cov = jnp.concatenate(segs, axis=-1)
    return {"z": z, "cov_params": cov, "latent_params": (mu, logvar)}


if __name__ == "__main__":
    root = jax.random.PRNGKey(0)
    k_params, k_x, k_eps = jax.random.split(root, 3)

    raw_params = init_raw_params(k_params)
    kernel_params = pack_params(raw_params)

    x = jax.random.normal(k_x, (BATCH, INPUT_DIM), jnp.float32)
    eps = jax.random.normal(k_eps, (BATCH, LATENT_DIM), jnp.float32)

    out = vae_forward(x, eps, kernel_params)
    jax.block_until_ready(out)

    assert out["z"].shape == (BATCH, LATENT_DIM)
    assert out["cov_params"].shape == (BATCH, COV_DIM)
    assert out["latent_params"][0].shape == (BATCH, LATENT_DIM)
    assert out["latent_params"][1].shape == (BATCH, LATENT_DIM)
    assert bool(jnp.all(jnp.isfinite(out["z"])))
    assert bool(jnp.all(jnp.isfinite(out["cov_params"])))

    ref = vae_forward_ref(x, eps, raw_params)
    assert bool(jnp.allclose(out["z"], ref["z"], atol=1e-4, rtol=1e-4))
    assert bool(jnp.allclose(out["cov_params"], ref["cov_params"], atol=1e-4, rtol=1e-4))
    assert bool(jnp.allclose(out["latent_params"][0], ref["latent_params"][0], atol=1e-4, rtol=1e-4))
    assert bool(jnp.allclose(out["latent_params"][1], ref["latent_params"][1], atol=1e-4, rtol=1e-4))

    print("KERNEL_OK")
</pallas_src>

<mosaic_0001>
module attributes {stable_mosaic.version = 11 : i64} {
  func.func @_vae_kernel(%arg0: i32, %arg1: memref<32x16xf32, #tpu.memory_space<vmem>>, %arg2: memref<16x256xf32, #tpu.memory_space<vmem>>, %arg3: memref<1x256xf32, #tpu.memory_space<vmem>>, %arg4: memref<128x256xf32, #tpu.memory_space<vmem>>, %arg5: memref<1x256xf32, #tpu.memory_space<vmem>>, %arg6: memref<128x128xf32, #tpu.memory_space<vmem>>, %arg7: memref<1x128xf32, #tpu.memory_space<vmem>>, %arg8: memref<128x128xf32, #tpu.memory_space<vmem>>, %arg9: memref<1x128xf32, #tpu.memory_space<vmem>>, %arg10: memref<32x128xf32, #tpu.memory_space<vmem>>) attributes {dimension_semantics = [#tpu.dimension_semantics<parallel>], iteration_bounds = array<i64: 2>, scalar_prefetch = 0 : i64, scratch_operands = 0 : i64, tpu.core_type = #tpu.core_type<tc>, window_params = [{transform_indices = @transform_0, window_bounds = array<i64: 32, 16>}, {pipeline_mode = #tpu.pipeline_mode<synchronous>, transform_indices = @transform_1, window_bounds = array<i64: 16, 256>}, {pipeline_mode = #tpu.pipeline_mode<synchronous>, transform_indices = @transform_2, window_bounds = array<i64: 1, 256>}, {pipeline_mode = #tpu.pipeline_mode<synchronous>, transform_indices = @transform_3, window_bounds = array<i64: 128, 256>}, {pipeline_mode = #tpu.pipeline_mode<synchronous>, transform_indices = @transform_4, window_bounds = array<i64: 1, 256>}, {pipeline_mode = #tpu.pipeline_mode<synchronous>, transform_indices = @transform_5, window_bounds = array<i64: 128, 128>}, {pipeline_mode = #tpu.pipeline_mode<synchronous>, transform_indices = @transform_6, window_bounds = array<i64: 1, 128>}, {pipeline_mode = #tpu.pipeline_mode<synchronous>, transform_indices = @transform_7, window_bounds = array<i64: 128, 128>}, {pipeline_mode = #tpu.pipeline_mode<synchronous>, transform_indices = @transform_8, window_bounds = array<i64: 1, 128>}, {transform_indices = @transform_9, window_bounds = array<i64: 32, 128>}]} {
    %c0 = arith.constant 0 : index
    %c0_0 = arith.constant 0 : index
    %0 = vector.load %arg1[%c0, %c0_0] : memref<32x16xf32, #tpu.memory_space<vmem>>, vector<32x16xf32>
    %c0_1 = arith.constant 0 : index
    %c0_2 = arith.constant 0 : index
    %1 = vector.load %arg2[%c0_1, %c0_2] : memref<16x256xf32, #tpu.memory_space<vmem>>, vector<16x256xf32>
    %cst = arith.constant dense<0.000000e+00> : vector<32x256xf32>
    %2 = tpu.matmul %0, %1, %cst {dimension_numbers = #tpu.dot_dimension_numbers<[1], [0], [0], [1], [0, 0, 1, 1], [], []>} : vector<32x16xf32>, vector<16x256xf32>, vector<32x256xf32> -> vector<32x256xf32>
    %c0_3 = arith.constant 0 : index
    %c0_4 = arith.constant 0 : index
    %3 = vector.load %arg3[%c0_3, %c0_4] : memref<1x256xf32, #tpu.memory_space<vmem>>, vector<1x256xf32>
    %4 = vector.broadcast %3 : vector<1x256xf32> to vector<32x256xf32>
    %5 = arith.addf %2, %4 : vector<32x256xf32>
    %6 = vector.extract_strided_slice %5 {offsets = [0, 0], sizes = [32, 128], strides = [1, 1]} : vector<32x256xf32> to vector<32x128xf32>
    %cst_5 = arith.constant 0.000000e+00 : f32
    %7 = vector.broadcast %cst_5 : f32 to vector<32x128xf32>
    %8 = arith.maximumf %6, %7 : vector<32x128xf32>
    %9 = vector.extract_strided_slice %5 {offsets = [0, 128], sizes = [32, 128], strides = [1, 1]} : vector<32x256xf32> to vector<32x128xf32>
    %c0_6 = arith.constant 0 : index
    %c0_7 = arith.constant 0 : index
    %10 = vector.load %arg4[%c0_6, %c0_7] : memref<128x256xf32, #tpu.memory_space<vmem>>, vector<128x256xf32>
    %cst_8 = arith.constant dense<0.000000e+00> : vector<32x256xf32>
    %11 = tpu.matmul %8, %10, %cst_8 {dimension_numbers = #tpu.dot_dimension_numbers<[1], [0], [0], [1], [0, 0, 1, 1], [], []>} : vector<32x128xf32>, vector<128x256xf32>, vector<32x256xf32> -> vector<32x256xf32>
    %c0_9 = arith.constant 0 : index
    %c0_10 = arith.constant 0 : index
    %12 = vector.load %arg5[%c0_9, %c0_10] : memref<1x256xf32, #tpu.memory_space<vmem>>, vector<1x256xf32>
    %13 = vector.broadcast %12 : vector<1x256xf32> to vector<32x256xf32>
    %14 = arith.addf %11, %13 : vector<32x256xf32>
    %15 = vector.extract_strided_slice %14 {offsets = [0, 0], sizes = [32, 128], strides = [1, 1]} : vector<32x256xf32> to vector<32x128xf32>
    %16 = vector.extract_strided_slice %14 {offsets = [0, 128], sizes = [32, 128], strides = [1, 1]} : vector<32x256xf32> to vector<32x128xf32>
    %cst_11 = arith.constant 5.000000e-01 : f32
    %17 = vector.broadcast %cst_11 : f32 to vector<32x128xf32>
    %18 = arith.mulf %17, %16 : vector<32x128xf32>
    %19 = math.exp %18 : vector<32x128xf32>
    %20 = arith.mulf %9, %19 : vector<32x128xf32>
    %21 = arith.addf %15, %20 : vector<32x128xf32>
    %c0_12 = arith.constant 0 : index
    %c0_13 = arith.constant 0 : index
    %22 = vector.load %arg6[%c0_12, %c0_13] : memref<128x128xf32, #tpu.memory_space<vmem>>, vector<128x128xf32>
    %cst_14 = arith.constant dense<0.000000e+00> : vector<32x128xf32>
    %23 = tpu.matmul %21, %22, %cst_14 {dimension_numbers = #tpu.dot_dimension_numbers<[1], [0], [0], [1], [0, 0, 1, 1], [], []>} : vector<32x128xf32>, vector<128x128xf32>, vector<32x128xf32> -> vector<32x128xf32>
    %c0_15 = arith.constant 0 : index
    %c0_16 = arith.constant 0 : index
    %24 = vector.load %arg7[%c0_15, %c0_16] : memref<1x128xf32, #tpu.memory_space<vmem>>, vector<1x128xf32>
    %25 = vector.broadcast %24 : vector<1x128xf32> to vector<32x128xf32>
    %26 = arith.addf %23, %25 : vector<32x128xf32>
    %cst_17 = arith.constant 0.000000e+00 : f32
    %27 = vector.broadcast %cst_17 : f32 to vector<32x128xf32>
    %28 = arith.maximumf %26, %27 : vector<32x128xf32>
    %c0_18 = arith.constant 0 : index
    %c0_19 = arith.constant 0 : index
    %29 = vector.load %arg8[%c0_18, %c0_19] : memref<128x128xf32, #tpu.memory_space<vmem>>, vector<128x128xf32>
    %cst_20 = arith.constant dense<0.000000e+00> : vector<32x128xf32>
    %30 = tpu.matmul %28, %29, %cst_20 {dimension_numbers = #tpu.dot_dimension_numbers<[1], [0], [0], [1], [0, 0, 1, 1], [], []>} : vector<32x128xf32>, vector<128x128xf32>, vector<32x128xf32> -> vector<32x128xf32>
    %c0_21 = arith.constant 0 : index
    %c0_22 = arith.constant 0 : index
    %31 = vector.load %arg9[%c0_21, %c0_22] : memref<1x128xf32, #tpu.memory_space<vmem>>, vector<1x128xf32>
    %32 = vector.broadcast %31 : vector<1x128xf32> to vector<32x128xf32>
    %33 = arith.addf %30, %32 : vector<32x128xf32>
    %34 = tpu.iota {dimensions = array<i32: 1>} : vector<1x128xi32>
    %false = arith.constant false
    %35 = vector.broadcast %false : i1 to vector<1x128xi1>
    %c17_i32 = arith.constant 17 : i32
    %36 = vector.broadcast %c17_i32 : i32 to vector<1x128xi32>
    %37 = arith.cmpi eq, %34, %36 : vector<1x128xi32>
    %38 = arith.ori %35, %37 : vector<1x128xi1>
    %c19_i32 = arith.constant 19 : i32
    %39 = vector.broadcast %c19_i32 : i32 to vector<1x128xi32>
    %40 = arith.cmpi eq, %34, %39 : vector<1x128xi32>
    %41 = arith.ori %38, %40 : vector<1x128xi1>
    %c26_i32 = arith.constant 26 : i32
    %42 = vector.broadcast %c26_i32 : i32 to vector<1x128xi32>
    %43 = arith.cmpi eq, %34, %42 : vector<1x128xi32>
    %44 = arith.ori %41, %43 : vector<1x128xi1>
    %cst_23 = arith.constant 0.000000e+00 : f32
    %45 = vector.broadcast %cst_23 : f32 to vector<32x128xf32>
    %46 = arith.maximumf %33, %45 : vector<32x128xf32>
    %47 = vector.broadcast %cst_23 : f32 to vector<32x128xf32>
    %48 = arith.subf %33, %47 : vector<32x128xf32>
    %49 = arith.cmpf one, %48, %48 : vector<32x128xf32>
    %50 = vector.broadcast %cst_23 : f32 to vector<32x128xf32>
    %51 = arith.addf %33, %50 : vector<32x128xf32>
    %52 = math.absf %48 : vector<32x128xf32>
    %cst_24 = arith.constant 0.000000e+00 : f32
    %53 = vector.broadcast %cst_24 : f32 to vector<32x128xf32>
    %54 = arith.subf %53, %52 : vector<32x128xf32>
    %55 = math.exp %54 : vector<32x128xf32>
    %56 = math.log1p %55 : vector<32x128xf32>
    %57 = arith.addf %46, %56 : vector<32x128xf32>
    %58 = arith.select %49, %51, %57 : vector<32x128xi1>, vector<32x128xf32>
    %59 = vector.shape_cast %44 : vector<1x128xi1> to vector<1x128xi1>
    %60 = vector.broadcast %59 : vector<1x128xi1> to vector<32x128xi1>
    %61 = arith.select %60, %58, %33 : vector<32x128xi1>, vector<32x128xf32>
    %false_25 = arith.constant false
    %62 = vector.broadcast %false_25 : i1 to vector<1x128xi1>
    %c20_i32 = arith.constant 20 : i32
    %63 = vector.broadcast %c20_i32 : i32 to vector<1x128xi32>
    %64 = arith.cmpi eq, %34, %63 : vector<1x128xi32>
    %65 = arith.ori %62, %64 : vector<1x128xi1>
    %c24_i32 = arith.constant 24 : i32
    %66 = vector.broadcast %c24_i32 : i32 to vector<1x128xi32>
    %67 = arith.cmpi eq, %34, %66 : vector<1x128xi32>
    %68 = arith.ori %65, %67 : vector<1x128xi1>
    %69 = arith.negf %33 : vector<32x128xf32>
    %70 = math.exp %69 : vector<32x128xf32>
    %cst_26 = arith.constant 1.000000e+00 : f32
    %71 = vector.broadcast %cst_26 : f32 to vector<32x128xf32>
    %72 = arith.addf %71, %70 : vector<32x128xf32>
    %73 = arith.divf %71, %72 : vector<32x128xf32>
    %74 = vector.shape_cast %68 : vector<1x128xi1> to vector<1x128xi1>
    %75 = vector.broadcast %74 : vector<1x128xi1> to vector<32x128xi1>
    %76 = arith.select %75, %73, %61 : vector<32x128xi1>, vector<32x128xf32>
    %c21_i32 = arith.constant 21 : i32
    %77 = vector.broadcast %c21_i32 : i32 to vector<1x128xi32>
    %78 = arith.cmpi sge, %34, %77 : vector<1x128xi32>
    %c24_i32_27 = arith.constant 24 : i32
    %79 = vector.broadcast %c24_i32_27 : i32 to vector<1x128xi32>
    %80 = arith.cmpi slt, %34, %79 : vector<1x128xi32>
    %81 = arith.andi %78, %80 : vector<1x128xi1>
    %cst_28 = arith.constant 0xFF800000 : f32
    %82 = vector.shape_cast %81 : vector<1x128xi1> to vector<1x128xi1>
    %83 = vector.broadcast %82 : vector<1x128xi1> to vector<32x128xi1>
    %84 = vector.broadcast %cst_28 : f32 to vector<32x128xf32>
    %85 = arith.select %83, %33, %84 : vector<32x128xi1>, vector<32x128xf32>
    %cst_29 = arith.constant dense<0xFF800000> : vector<32xf32>
    %86 = vector.multi_reduction <maximumf>, %85, %cst_29 [1] : vector<32x128xf32> to vector<32xf32>
    %87 = vector.shape_cast %86 : vector<32xf32> to vector<32x1xf32>
    %88 = vector.broadcast %87 : vector<32x1xf32> to vector<32x128xf32>
    %89 = arith.subf %85, %88 : vector<32x128xf32>
    %90 = math.exp %89 : vector<32x128xf32>
    %cst_30 = arith.constant dense<0.000000e+00> : vector<32xf32>
    %91 = vector.multi_reduction <add>, %90, %cst_30 [1] : vector<32x128xf32> to vector<32xf32>
    %92 = vector.shape_cast %91 : vector<32xf32> to vector<32x1xf32>
    %93 = vector.broadcast %92 : vector<32x1xf32> to vector<32x128xf32>
    %94 = arith.divf %90, %93 : vector<32x128xf32>
    %95 = vector.shape_cast %81 : vector<1x128xi1> to vector<1x128xi1>
    %96 = vector.broadcast %95 : vector<1x128xi1> to vector<32x128xi1>
    %97 = arith.select %96, %94, %76 : vector<32x128xi1>, vector<32x128xf32>
    %c16_i32 = arith.constant 16 : i32
    %98 = vector.broadcast %c16_i32 : i32 to vector<1x128xi32>
    %99 = arith.cmpi slt, %34, %98 : vector<1x128xi32>
    %100 = vector.shape_cast %99 : vector<1x128xi1> to vector<1x128xi1>
    %101 = vector.broadcast %100 : vector<1x128xi1> to vector<32x128xi1>
    %102 = arith.select %101, %21, %97 : vector<32x128xi1>, vector<32x128xf32>
    %c0_31 = arith.constant 0 : index
    %c0_32 = arith.constant 0 : index
    %103 = vector.load %arg10[%c0_31, %c0_32] : memref<32x128xf32, #tpu.memory_space<vmem>>, vector<32x128xf32>
    tpu.vector_store %arg10[%c0_31, %c0_32], %102 {strides = array<i32>} : memref<32x128xf32, #tpu.memory_space<vmem>>, vector<32x128xf32>,
    return
  }
  func.func @transform_0(%arg0: i32) -> (i32, i32) {
    %c0_i32 = arith.constant 0 : i32
    %c0_i32_0 = arith.constant 0 : i32
    return %arg0, %c0_i32 : i32, i32
  }
  func.func @transform_1(%arg0: i32) -> (i32, i32) {
    %c0_i32 = arith.constant 0 : i32
    %c0_i32_0 = arith.constant 0 : i32
    %c0_i32_1 = arith.constant 0 : i32
    return %c0_i32, %c0_i32_0 : i32, i32
  }
  func.func @transform_2(%arg0: i32) -> (i32, i32) {
    %c0_i32 = arith.constant 0 : i32
    %c0_i32_0 = arith.constant 0 : i32
    %c0_i32_1 = arith.constant 0 : i32
    return %c0_i32, %c0_i32_0 : i32, i32
  }
  func.func @transform_3(%arg0: i32) -> (i32, i32) {
    %c0_i32 = arith.constant 0 : i32
    %c0_i32_0 = arith.constant 0 : i32
    %c0_i32_1 = arith.constant 0 : i32
    return %c0_i32, %c0_i32_0 : i32, i32
  }
  func.func @transform_4(%arg0: i32) -> (i32, i32) {
    %c0_i32 = arith.constant 0 : i32
    %c0_i32_0 = arith.constant 0 : i32
    %c0_i32_1 = arith.constant 0 : i32
    return %c0_i32, %c0_i32_0 : i32, i32
  }
  func.func @transform_5(%arg0: i32) -> (i32, i32) {
    %c0_i32 = arith.constant 0 : i32
    %c0_i32_0 = arith.constant 0 : i32
    %c0_i32_1 = arith.constant 0 : i32
    return %c0_i32, %c0_i32_0 : i32, i32
  }
  func.func @transform_6(%arg0: i32) -> (i32, i32) {
    %c0_i32 = arith.constant 0 : i32
    %c0_i32_0 = arith.constant 0 : i32
    %c0_i32_1 = arith.constant 0 : i32
    return %c0_i32, %c0_i32_0 : i32, i32
  }
  func.func @transform_7(%arg0: i32) -> (i32, i32) {
    %c0_i32 = arith.constant 0 : i32
    %c0_i32_0 = arith.constant 0 : i32
    %c0_i32_1 = arith.constant 0 : i32
    return %c0_i32, %c0_i32_0 : i32, i32
  }
  func.func @transform_8(%arg0: i32) -> (i32, i32) {
    %c0_i32 = arith.constant 0 : i32
    %c0_i32_0 = arith.constant 0 : i32
    %c0_i32_1 = arith.constant 0 : i32
    return %c0_i32, %c0_i32_0 : i32, i32
  }
  func.func @transform_9(%arg0: i32) -> (i32, i32) {
    %c0_i32 = arith.constant 0 : i32
    %c0_i32_0 = arith.constant 0 : i32
    return %arg0, %c0_i32 : i32, i32
  }
}

</mosaic_0001>

<bundles_post_ra>
// kernel: tpu_custom_call.1
= control target key start
LH: loop header
LB: loop body
LE: loop exit
PB: predicated region body
PF: predicated region fallthrough
CT: control target
= control target key end

     0   :  { %s1993_s0 = inlined_call_operand.vmem [shape: f32[64,16], index: 0, kind: input, shape index: {}]   ;;  %s1994_s1 = inlined_call_operand.vmem [shape: f32[16,256], index: 1, kind: input, shape index: {}]   ;;  %s1995_s2 = inlined_call_operand.vmem [shape: f32[1,256], index: 2, kind: input, shape index: {}]   ;;  %s1996_s3 = inlined_call_operand.hbm [shape: f32[128,256], index: 3, kind: input, shape index: {}]   ;;  %s1997_s4 = inlined_call_operand.vmem [shape: f32[1,256], index: 4, kind: input, shape index: {}]   ;;  %s1998_s5 = inlined_call_operand.hbm [shape: f32[128,128], index: 5, kind: input, shape index: {}]   ;;  %s1999_s6 = inlined_call_operand.vmem [shape: f32[1,128], index: 6, kind: input, shape index: {}]   ;;  %s2000_s7 = inlined_call_operand.hbm [shape: f32[128,128], index: 7, kind: input, shape index: {}]   ;;  %s2001_s8 = inlined_call_operand.vmem [shape: f32[1,128], index: 8, kind: input, shape index: {}]   ;;  %s2002_s9 = inlined_call_operand.hbm [shape: f32[64,128], index: 9, kind: output, shape index: {}]  }
   0x1   :  { %2004 = sst [smem:[#allocation14_spill]] %s1996_s3 }
   0x2   :  { %2005 = sst [smem:[#allocation15_spill]] %s1998_s5 }
   0x3   :  { %14 = vsyncpa [#allocation3], 0 }
   0x4   :  { %15 = vsyncpa [#allocation6], 0 }
   0x5   :  { %16 = vsyncpa [#allocation4], 0 }
   0x6   :  { %18 = vsyncpa [#allocation4 + $0x1], 0  ;;  %s1468_s30 = smov 0   ;;  %s1470_s10 = smov 0  }
   0x7   :  { %s1472_s11 = smov 0   ;;  %s1474_s12 = smov 0  }
   0x8 LB: > { %2006 = sst [smem:[#allocation12_spill]] %s1403_s11  ;;  %s1489_s13 = sadd.s32 4294967295, %s1407_s12   ;;  %s1407_s12 = sphi %s1474_s12, %s2044_s12   ;;  %s1403_s11 = sphi %s1472_s11, %s2041_s11   ;;  %s1399_s10 = sphi %s1470_s10, %s2043_s10   ;;  %s1395_s30 = sphi %s1468_s30, %s2042_s30  }
   0x9   : > { %s1082_s14 = sadd.s32 4294967294, %s1407_s12   ;;  %s1493_s15 = sadd.s32 1, %s1407_s12  }
   0xa   : > { %s225_s16 = sadd.s32 1, %s1403_s11  ;;  %s222_s17 = ssub.s32 %s1407_s12, %s1493_s15 }
   0xb   : > { %p235_p0 = scmp.ne.s32.totalorder %s1403_s11, %s1399_s10  ;;  %p223_p1 = scmp.eq.s32.totalorder %s222_s17, 0 }
   0xc   : > { %p236_p2 = scmp.eq.s32.totalorder %s1489_s13, 1  ;;  %p241_p3 = scmp.ne.s32.totalorder %s1399_s10, %s1395_s30 }
   0xd   : > { %p242_p4 = scmp.eq.s32.totalorder %s1082_s14, 1  ;;  %p1083_p7 = scmp.ge.s32.totalorder %s1407_s12, 1 }
   0xe   : > { %s1504_s18 = scalar_select %p223_p1, %s1403_s11, %s225_s16  }
   0xf   : > { %p1506_p5 = por %p236_p2, %p235_p0  ;;  %p1510_p6 = por %p242_p4, %p241_p3 }
  0x10   : > { %2007 = sst [smem:[#allocation13_spill]] %s1504_s18  ;;  %p249_p8 = scmp.lt.s32.totalorder %s1407_s12, 3 }
  0x11   : > { %p1141_p9 = scmp.eq.s32.totalorder %s1489_s13, 0  ;;  %s2011_s5 = sld [smem:[#allocation15_spill]] }
  0x12   : > { %p1517_p10 = pnand %p1083_p7, %p249_p8  ;;  %s1409_s25 = smov [#allocation5]  }
  0x13   : > { %s285_s26 = sshll.u32 %s1409_s25, 4  ;;  %s2013_s3 = sld [smem:[#allocation14_spill]]  ;;  %s286_s26 = int_to_ptr.vmem [resolvable:$true] %s285_s26 }
  0x14   : > { %p1127_p11 = pneg %p1517_p10  ;;  %s1410_s16 = smov 128  }
  0x15   : > { %s1411_s17 = smov 8   ;;  %s1412_s22 = smov [#allocation2]  }
  0x16   : > { %p1528_p12 = pnand %p1141_p9, %p1127_p11  ;;  %s268_s23 = sshll.u32 %s1412_s22, 4  ;;  %s269_s23 = int_to_ptr.vmem [resolvable:$true] %s268_s23 }
  0x17   : > { %s283_s24 = sshll.u32 %s2011_s5, 4  ;;  %s1413_s25 = smov 256   ;;  %s284_s24 = int_to_ptr.hbm [resolvable:$true] %s283_s24 }
  0x18   : > { %1133 = dma.hbm_to_vmem [thread:$0]  (!%p1528_p12), %s284_s24, 2048, %s286_s26, [#allocation6], %s1410_s16, %s1410_s16, %s1411_s17  }
  0x19   : > { %s266_s14 = sshll.u32 %s2013_s3, 4  ;;  %s1414_s5 = smov 16   ;;  %s267_s14 = int_to_ptr.hbm [resolvable:$true] %s266_s14 }
  0x1a   : > { %1130 = dma.hbm_to_vmem [thread:$0]  (!%p1528_p12), %s267_s14, 4096, %s269_s23, [#allocation3], %s1413_s25, %s1413_s25, %s1414_s5  }
  0x1b   : > { %s300_s28 = sshll.u32 %s2000_s7, 4  ;;  %s1415_s29 = smov [#allocation7]   ;;  %s301_s28 = int_to_ptr.hbm [resolvable:$true] %s300_s28 }
  0x1c   : > { %s302_s3 = sshll.u32 %s1415_s29, 4  ;;  %330 = sbr.rel (%p1517_p10) target bundleno = 873 (0x369), region = 56  ;;  %s303_s3 = int_to_ptr.vmem [resolvable:$true] %s302_s3 }
  0x1d   : > { %1136 = dma.hbm_to_vmem [thread:$0]  (!%p1528_p12), %s301_s28, 2048, %s303_s3, [#allocation6], %s1410_s16, %s1410_s16, %s1411_s17  }
  0x21   : > { %1382 = dma.done.wait (%p1141_p9), [#allocation3], 4096  }
  0x22   : > { %1384 = vsyncadd (%p1141_p9), [#allocation3], 4294963200 }
  0x23   : > { %1386 = dma.done.wait (%p1141_p9), [#allocation6], 4096  }
  0x24   : > { %1388 = vsyncadd (%p1141_p9), [#allocation6], 4294963200  ;;  %s1093_s5 = sshll.u32 %s1489_s13, 2  ;;  %v390_v0 = vld [vmem:[%s1994_s1 + $0x10] sm:$0xff]  ;;  %v388_v1 = vld [vmem:[%s1994_s1] sm:$0xff]  ;;  %vm398_vm0 = vcmask 130048  }
  0x25   : > { %p378_p13 = scmp.lt.s32.totalorder %s1093_s5, 7  ;;  %425 = vmatpush.msra.mxu0 %v390_v0  ;;  %v503_v3 = vld [vmem:[#allocation2 + $0xf0] sm:$0xff]  ;;  %v504_v4 = vld [vmem:[#allocation2 + $0xf8] sm:$0xff]  ;;  %v501_v5 = vld [vmem:[#allocation2 + $0xe0] sm:$0xff]  ;;  %s374_s24 = sand.u32 1, %s1399_s10  }
  0x26   : > { %511 = vmatpush.msra.mxu2 %v503_v3  ;;  %v502_v6 = vld [vmem:[#allocation2 + $0xe8] sm:$0xff]  ;;  %540 = vmatpush.msra.mxu3 %v504_v4  ;;  %v499_v7 = vld [vmem:[#allocation2 + $0xd0] sm:$0xff]  ;;  %v500_v8 = vld [vmem:[#allocation2 + $0xd8] sm:$0xff]  ;;  %s1092_s26 = sshll.u32 %s374_s24, 5  ;;  %s1112_s14 = sshll.u32 %s1489_s13, 5 }
  0x27   : > { %s2046_s5 = smov (!%p378_p13, %s1093_s5), 7  ;;  %426 = vmatpush.msra.mxu0 %v388_v1  ;;  %v497_v9 = vld [vmem:[#allocation2 + $0xc0] sm:$0xff]  ;;  %v498_v10 = vld [vmem:[#allocation2 + $0xc8] sm:$0xff]  ;;  %v495_v11 = vld [vmem:[#allocation2 + $0xb0] sm:$0xff]  ;;  %s1860_s27 = scalar_lea.vmem [#allocation8], %s1092_s26 }
  0x28   : > { %s1094_s3 = sshll.u32 %s2046_s5, 3  ;;  %512 = vmatpush.msra.mxu2 %v501_v5  ;;  %541 = vmatpush.msra.mxu3 %v502_v6  ;;  %v496_v13 = vld [vmem:[#allocation2 + $0xb8] sm:$0xff]  ;;  %v493_v14 = vld [vmem:[#allocation2 + $0xa0] sm:$0xff]  ;;  %v494_v15 = vld [vmem:[#allocation2 + $0xa8] sm:$0xff]  ;;  %s985_s17 = scalar_lea.hbm %s2002_s9, %s1112_s14 }
  0x29   : > { %s1558_s21 = scalar_lea.vmem %s1993_s0, %s1094_s3  ;;  %v491_v16 = vld [vmem:[#allocation2 + $0x90] sm:$0xff]  ;;  %v492_v17 = vld [vmem:[#allocation2 + $0x98] sm:$0xff]  ;;  %v489_v18 = vld [vmem:[#allocation2 + $0x80] sm:$0xff]  ;;  %s986_s22 = sshll.u32 %s1860_s27, 4  ;;  %s987_s22 = int_to_ptr.vmem [resolvable:$true] %s986_s22 }
  0x2a   : > { %v1567_v2 = vld [vmem:[%s1558_s21] sm:$0xff]  ;;  %513 = vmatpush.msra.mxu2 %v499_v7  ;;  %542 = vmatpush.msra.mxu3 %v500_v8  ;;  %v1572_v12 = vld [vmem:[%s1558_s21 + $0x8] sm:$0xff]  ;;  %v487_v20 = vld [vmem:[#allocation2 + $0x70] sm:$0xff]  ;;  %s988_s23 = sshll.u32 %s985_s17, 4  ;;  %s974_s25 = scalar_lea.sflag [#allocation4], %s374_s24  ;;  %s989_s23 = int_to_ptr.hbm [resolvable:$true] %s988_s23 }
  0x2b   : > { %1095 = vmatmul.msk.f32.vlgmr.msra.gmra.mxu0 %vm398_vm0, %v1567_v2  ;;  %v490_v19 = vld [vmem:[#allocation2 + $0x88] sm:$0xff]  ;;  %v386_v21 = vld [vmem:[%s1558_s21 + $0x10] sm:$0xff]  ;;  %v488_v22 = vld [vmem:[#allocation2 + $0x78] sm:$0xff]  ;;  %s1351_s28 = sshra.s32 %s989_s23, 4  ;;  %s1357_s11 = scalar_lea.hbm %s2002_s9, 64  ;;  %s1352_s28 = int_to_ptr.hbm [resolvable:$true] %s1351_s28 }
  0x2c   : > { %514 = vmatpush.msra.mxu2 %v497_v9  ;;  %543 = vmatpush.msra.mxu3 %v498_v10  ;;  %v485_v23 = vld [vmem:[#allocation2 + $0x60] sm:$0xff]  ;;  %v486_v24 = vld [vmem:[#allocation2 + $0x68] sm:$0xff]  ;;  %v483_v25 = vld [vmem:[#allocation2 + $0x50] sm:$0xff]  ;;  %s1353_s29 = scalar_lea.hbm %s1352_s28, 32  ;;  %p1358_p3 = scmp.lt.s32.totalorder %s1352_s28, %s2002_s9 }
  0x2d   : > { %v484_v26 = vld [vmem:[#allocation2 + $0x58] sm:$0xff]  ;;  %v481_v27 = vld [vmem:[#allocation2 + $0x40] sm:$0xff]  ;;  %v482_v28 = vld [vmem:[#allocation2 + $0x48] sm:$0xff]  ;;  %p1354_p0 = scmp.ne.s32.totalorder %s1352_s28, %s1353_s29  ;;  %p1359_p4 = scmp.lt.s32.totalorder %s1357_s11, %s1353_s29 }
  0x2e   : > { %515 = vmatpush.msra.mxu2 %v495_v11  ;;  %544 = vmatpush.msra.mxu3 %v496_v13  ;;  %v479_v29 = vld [vmem:[#allocation2 + $0x30] sm:$0xff]  ;;  %v387_v30 = vld [vmem:[%s1558_s21 + $0x18] sm:$0xff]  ;;  %v477_v32 = vld [vmem:[#allocation2 + $0x20] sm:$0xff] }
  0x2f   : > { %v480_v31 = vld [vmem:[#allocation2 + $0x38] sm:$0xff]  ;;  %v478_v33 = vld [vmem:[#allocation2 + $0x28] sm:$0xff]  ;;  %v475_v34 = vld [vmem:[#allocation2 + $0x10] sm:$0xff]  ;;  %p1355_p1 = pnand %p1354_p0, %p1506_p5  ;;  %p1360_p7 = por %p1359_p4, %p1358_p3 }
  0x30   : > { %516 = vmatpush.msra.mxu2 %v493_v14  ;;  %545 = vmatpush.msra.mxu3 %v494_v15  ;;  %v476_v35 = vld [vmem:[#allocation2 + $0x18] sm:$0xff]  ;;  %v473_v36 = vld [vmem:[#allocation2] sm:$0xff]  ;;  %v474_v37 = vld [vmem:[#allocation2 + $0x8] sm:$0xff] }
  0x31   : > { %v391_v38 = vld [vmem:[%s1994_s1 + $0x18] sm:$0xff]  ;;  %v389_v39 = vld [vmem:[%s1994_s1 + $0x8] sm:$0xff]  ;;  %v1591_v40 = vld [vmem:[%s1995_s2] sm:$0x3]  ;;  %p1356_p2 = pneg %p1355_p1 }
  0x32   : > { %517 = vmatpush.msra.mxu2 %v491_v16  ;;  %546 = vmatpush.msra.mxu3 %v492_v17  ;;  %v394_v41 = vperm.slane %v1591_v40, 0  ;;  %v604_v42 = vld [vmem:[#allocation5 + $0x78] sm:$0xff]  ;;  %v603_v43 = vld [vmem:[#allocation5 + $0x70] sm:$0xff]  ;;  %v602_v44 = vld [vmem:[#allocation5 + $0x68] sm:$0xff]  ;;  %v1602_v14 = vperm.slane %v1591_v40, 1 }
  0x33   : > { %1096 = vmatmul.msk.f32.gmra.mxu0 %vm398_vm0, %v1572_v12  ;;  %454 = vmatpush.msra.mxu1 %v391_v38  ;;  %v601_v47 = vld [vmem:[#allocation5 + $0x60] sm:$0xff]  ;;  %v600_v49 = vld [vmem:[#allocation5 + $0x58] sm:$0xff]  ;;  %v599_v50 = vld [vmem:[#allocation5 + $0x50] sm:$0xff]  ;;  %p1361_p8 = pnand %p1360_p7, %p1356_p2 }
  0x34   : > { %518 = vmatpush.msra.mxu2 %v489_v18  ;;  %547 = vmatpush.msra.mxu3 %v490_v19  ;;  %v598_v51 = vld [vmem:[#allocation5 + $0x48] sm:$0xff]  ;;  %v597_v61 = vld [vmem:[#allocation5 + $0x40] sm:$0xff]  ;;  %v596_v62 = vld [vmem:[#allocation5 + $0x38] sm:$0xff] }
  0x35   : > { %455 = vmatpush.msra.mxu1 %v389_v39  ;;  %609 = vmatpush.msrb.mxu0 %v604_v42  ;;  %v595_v63 = vld [vmem:[#allocation5 + $0x30] sm:$0xff]  ;;  %v594_v0 = vld [vmem:[#allocation5 + $0x28] sm:$0xff]  ;;  %v593_v1 = vld [vmem:[#allocation5 + $0x20] sm:$0xff] }
  0x36   : > { %519 = vmatpush.msra.mxu2 %v487_v20  ;;  %548 = vmatpush.msra.mxu3 %v488_v22  ;;  %v591_v3 = vld [vmem:[#allocation5 + $0x10] sm:$0xff]  ;;  %v590_v4 = vld [vmem:[#allocation5 + $0x8] sm:$0xff]  ;;  %v589_v5 = vld [vmem:[#allocation5] sm:$0xff] }
  0x37   : > { %1099 = vmatmul.msk.f32.vlgmr.msra.gmra.mxu1 %vm398_vm0, %v1567_v2  ;;  %610 = vmatpush.msrb.mxu0 %v603_v43  ;;  %v592_v2 = vld [vmem:[#allocation5 + $0x18] sm:$0xff]  ;;  %v505_v6 = vld [vmem:[%s1997_s4] sm:$0x3]  ;;  %v656_v20 = vld [vmem:[#allocation7 + $0x70] sm:$0xff] }
  0x38   : > { %520 = vmatpush.msra.mxu2 %v485_v23  ;;  %549 = vmatpush.msra.mxu3 %v486_v24  ;;  %v508_v7 = vperm.slane %v505_v6, 1  ;;  %v1604_v17 = vperm.slane %v505_v6, 0  ;;  %v657_v19 = vld [vmem:[#allocation7 + $0x78] sm:$0xff]  ;;  %v655_v23 = vld [vmem:[#allocation7 + $0x68] sm:$0xff]  ;;  %v650_v43 = vld [vmem:[#allocation7 + $0x40] sm:$0xff] }
  0x39   : > { %611 = vmatpush.msrb.mxu0 %v602_v44  ;;  %662 = vmatpush.msrb.mxu1 %v657_v19  ;;  %v1189_v6 = vld [vmem:[%s1999_s6] ss:$0 sm:$0xff]  ;;  %v691_v19 = vlaneseq }
  0x3a   : > { %521 = vmatpush.msra.mxu2 %v483_v25  ;;  %550 = vmatpush.msra.mxu3 %v484_v26 }
  0x3b   : > { %1097 = vmatmul.msk.f32.gmra.mxu0 %vm398_vm0, %v386_v21  ;;  %663 = vmatpush.msrb.mxu1 %v656_v20  ;;  %v1629_v20 = vand.u32 127, %v691_v19 }
  0x3c   : > { %522 = vmatpush.msra.mxu2 %v481_v27  ;;  %551 = vmatpush.msra.mxu3 %v482_v28  ;;  %v654_v28 = vld [vmem:[#allocation7 + $0x60] sm:$0xff] }
  0x3d   : > { %612 = vmatpush.msrb.mxu0 %v601_v47  ;;  %664 = vmatpush.msrb.mxu1 %v655_v23  ;;  %vm861_vm1 = vcmp.ge.s32.totalorder %v1629_v20, 21  ;;  %vm862_vm2 = vcmp.lt.s32.totalorder %v1629_v20, 24  ;;  %vm693_vm4 = vcmp.eq.s32.totalorder %v1629_v20, 17  ;;  %vm694_vm5 = vcmp.eq.s32.totalorder %v1629_v20, 19 }
  0x3e   : > { %523 = vmatpush.msra.mxu2 %v479_v29  ;;  %552 = vmatpush.msra.mxu3 %v480_v31  ;;  %vm1638_vm3 = vmand %vm861_vm1, %vm862_vm2  ;;  %vm696_vm7 = vcmp.eq.s32.totalorder %v1629_v20, 26  ;;  %vm776_vm8 = vcmp.eq.s32.totalorder %v1629_v20, 20  ;;  %vm777_vm9 = vcmp.eq.s32.totalorder %v1629_v20, 24 }
  0x3f   : > { %1100 = vmatmul.msk.f32.gmra.mxu1 %vm398_vm0, %v1572_v12  ;;  %613 = vmatpush.msrb.mxu0 %v600_v49  ;;  %vm695_vm12 = vmor %vm693_vm4, %vm694_vm5 }
  0x40   : > { %524 = vmatpush.msra.mxu2 %v477_v32  ;;  %553 = vmatpush.msra.mxu3 %v478_v33  ;;  %v653_v32 = vld [vmem:[#allocation7 + $0x58] sm:$0xff]  ;;  %vm1750_vm1 = vmor %vm695_vm12, %vm696_vm7 }
  0x41   : > { %614 = vmatpush.msrb.mxu0 %v599_v50  ;;  %665 = vmatpush.msrb.mxu1 %v654_v28  ;;  %v648_v50 = vld [vmem:[#allocation7 + $0x30] sm:$0xff]  ;;  %vm1782_vm4 = vmor %vm776_vm8, %vm777_vm9 }
  0x42   : > { %525 = vmatpush.msra.mxu2 %v475_v34  ;;  %554 = vmatpush.msra.mxu3 %v476_v35  ;;  %v652_v35 = vld [vmem:[#allocation7 + $0x50] sm:$0xff] }
  0x43   : > { %1098 = vmatmul.msk.f32.gmra.mxu0 %vm398_vm0, %v387_v30  ;;  %666 = vmatpush.msrb.mxu1 %v653_v32 }
  0x44   : > { %526 = vmatpush.msra.mxu2 %v473_v36  ;;  %555 = vmatpush.msra.mxu3 %v474_v37  ;;  %v651_v37 = vld [vmem:[#allocation7 + $0x48] sm:$0xff] }
  0x45   : > { %615 = vmatpush.msrb.mxu0 %v598_v51  ;;  %667 = vmatpush.msrb.mxu1 %v652_v35 }
  0x47   : > { %1101 = vmatmul.msk.f32.gmra.mxu1 %vm398_vm0, %v386_v21  ;;  %616 = vmatpush.msrb.mxu0 %v597_v61 }
  0x48   : > { %668 = vmatpush.msrb.mxu1 %v651_v37 }
  0x49   : > { %617 = vmatpush.msrb.mxu0 %v596_v62  ;;  %v644_v62 = vld [vmem:[#allocation7 + $0x10] sm:$0xff] }
  0x4a   : > { %669 = vmatpush.msrb.mxu1 %v650_v43 }
  0x4b   : > { %618 = vmatpush.msrb.mxu0 %v595_v63 }
  0x4d   : > { %619 = vmatpush.msrb.mxu0 %v594_v0 }
  0x4f   : > { %1102 = vmatmul.msk.f32.gmra.mxu1 %vm398_vm0, %v387_v30  ;;  %620 = vmatpush.msrb.mxu0 %v593_v1 }
  0x51   : > { %621 = vmatpush.msrb.mxu0 %v592_v2 }
  0x53   : > { %622 = vmatpush.msrb.mxu0 %v591_v3 }
  0x55   : > { %623 = vmatpush.msrb.mxu0 %v590_v4  ;;  %v643_v4 = vld [vmem:[#allocation7 + $0x8] sm:$0xff] }
  0x57   : > { %624 = vmatpush.msrb.mxu0 %v589_v5  ;;  %v642_v5 = vld [vmem:[#allocation7] sm:$0xff] }
  0xa8   : > { %v428_v45 = vpop.f32.mrf.mxu0 }
  0xa9   : > { %v429_v46 = vadd.f32 %v428_v45, %v394_v41 }
  0xab   : > { %v469_v48 = vmax.f32 %v429_v46, 0.0  ;;  %v649_v46 = vld [vmem:[#allocation7 + $0x38] sm:$0xff] }
  0xac   : > { %670 = vmatpush.msrb.mxu1 %v649_v46 }
  0xad   : > { %527 = vmatmul.f32.vlgmr.msra.gmra.mxu2 %v469_v48  ;;  %556 = vmatmul.f32.vlgmr.msra.gmra.mxu3 %v469_v48 }
  0xae   : > { %671 = vmatpush.msrb.mxu1 %v648_v50 }
  0xb0   : > { %v431_v52 = vpop.f32.mrf.mxu0 }
  0xb1   : > { %v432_v53 = vadd.f32 %v431_v52, %v394_v41  ;;  %v647_v52 = vld [vmem:[#allocation7 + $0x28] sm:$0xff] }
  0xb2   : > { %672 = vmatpush.msrb.mxu1 %v647_v52 }
  0xb3   : > { %v470_v54 = vmax.f32 %v432_v53, 0.0 }
  0xb4   : > { %v457_v10 = vpop.f32.mrf.mxu1 }
  0xb5   : > { %530 = vmatmul.f32.gmra.mxu2 %v470_v54  ;;  %559 = vmatmul.f32.gmra.mxu3 %v470_v54  ;;  %v458_v18 = vadd.f32 %v457_v10, %v1602_v14 }
  0xb8   : > { %v434_v55 = vpop.f32.mrf.mxu0 }
  0xb9   : > { %v435_v56 = vadd.f32 %v434_v55, %v394_v41 }
  0xbb   : > { %v471_v57 = vmax.f32 %v435_v56, 0.0 }
  0xbc   : > { %v460_v22 = vpop.f32.mrf.mxu1 }
  0xbd   : > { %533 = vmatmul.f32.gmra.mxu2 %v471_v57  ;;  %562 = vmatmul.f32.gmra.mxu3 %v471_v57  ;;  %v461_v34 = vadd.f32 %v460_v22, %v1602_v14  ;;  %v646_v57 = vld [vmem:[#allocation7 + $0x20] sm:$0xff] }
  0xbe   : > { %673 = vmatpush.msrb.mxu1 %v646_v57 }
  0xc0   : > { %v437_v58 = vpop.f32.mrf.mxu0 }
  0xc1   : > { %v438_v59 = vadd.f32 %v437_v58, %v394_v41 }
  0xc3   : > { %v472_v60 = vmax.f32 %v438_v59, 0.0 }
  0xc4   : > { %v463_v40 = vpop.f32.mrf.mxu1 }
  0xc5   : > { %536 = vmatmul.f32.gmra.mxu2 %v472_v60  ;;  %565 = vmatmul.f32.gmra.mxu3 %v472_v60  ;;  %v464_v49 = vadd.f32 %v463_v40, %v1602_v14  ;;  %v645_v60 = vld [vmem:[#allocation7 + $0x18] sm:$0xff] }
  0xc6   : > { %674 = vmatpush.msrb.mxu1 %v645_v60 }
  0xc8   : > { %675 = vmatpush.msrb.mxu1 %v644_v62 }
  0xca   : > { %676 = vmatpush.msrb.mxu1 %v643_v4 }
  0xcc   : > { %v466_v58 = vpop.f32.mrf.mxu1  ;;  %677 = vmatpush.msrb.mxu1 %v642_v5 }
  0xcd   : > { %v467_v61 = vadd.f32 %v466_v58, %v1602_v14 }
 0x130   : > { %v557_v8 = vpop.f32.mrf.mxu3  ;;  %v528_v12 = vpop.f32.mrf.mxu2 }
 0x131   : > { %v558_v9 = vadd.f32 %v557_v8, %v508_v7  ;;  %v529_v26 = vadd.f32 %v528_v12, %v1604_v17 }
 0x133   : > { %v569_v11 = vmul.f32 0.5, %v558_v9 }
 0x135   : > { %v573_v13 = vmul.f32 1.442695, %v569_v11 }
 0x137   : > { %1191 = vpow2.f32 %v573_v13 }
 0x138   : > { %v560_v15 = vpop.f32.mrf.mxu3  ;;  %v531_v29 = vpop.f32.mrf.mxu2 }
 0x139   : > { %v561_v16 = vadd.f32 %v560_v15, %v508_v7  ;;  %v532_v41 = vadd.f32 %v531_v29, %v1604_v17 }
 0x13b   : > { %v570_v21 = vmul.f32 0.5, %v561_v16 }
 0x13d   : > { %v1192_v24 = vpop.eup %1191  ;;  %v575_v25 = vmul.f32 1.442695, %v570_v21  ;;  %v1190_v21 = vld [vmem:[%s2001_s8] ss:$0 sm:$0xff] }
 0x13e   : > { %v581_v27 = vmul.f32 %v1192_v24, %v458_v18 }
 0x13f   : > { %1193 = vpow2.f32 %v575_v25 }
 0x140   : > { %v563_v30 = vpop.f32.mrf.mxu3  ;;  %v1608_v31 = vadd.f32 %v581_v27, %v529_v26  ;;  %v534_v47 = vpop.f32.mrf.mxu2 }
 0x141   : > { %v564_v33 = vadd.f32 %v563_v30, %v508_v7  ;;  %v535_v55 = vadd.f32 %v534_v47, %v1604_v17 }
 0x142   : > { %625 = vmatmul.f32.vlgmr.msrb.gmra.mxu0 %v1608_v31 }
 0x143   : > { %v571_v36 = vmul.f32 0.5, %v564_v33 }
 0x145   : > { %v1194_v38 = vpop.eup %1193  ;;  %v577_v39 = vmul.f32 1.442695, %v571_v36 }
 0x146   : > { %v582_v42 = vmul.f32 %v1194_v38, %v461_v34 }
 0x147   : > { %1195 = vpow2.f32 %v577_v39 }
 0x148   : > { %v566_v44 = vpop.f32.mrf.mxu3  ;;  %v1613_v45 = vadd.f32 %v582_v42, %v532_v41  ;;  %v537_v63 = vpop.f32.mrf.mxu2 }
 0x149   : > { %v567_v48 = vadd.f32 %v566_v44, %v508_v7  ;;  %v538_v1 = vadd.f32 %v537_v63, %v1604_v17 }
 0x14a   : > { %628 = vmatmul.f32.gmra.mxu0 %v1613_v45 }
 0x14b   : > { %v572_v51 = vmul.f32 0.5, %v567_v48 }
 0x14d   : > { %v1196_v53 = vpop.eup %1195  ;;  %v579_v54 = vmul.f32 1.442695, %v572_v51 }
 0x14e   : > { %v583_v56 = vmul.f32 %v1196_v53, %v464_v49 }
 0x14f   : > { %1197 = vpow2.f32 %v579_v54 }
 0x150   : > { %v1618_v59 = vadd.f32 %v583_v56, %v535_v55 }
 0x152   : > { %631 = vmatmul.f32.gmra.mxu0 %v1618_v59 }
 0x155   : > { %v1198_v0 = vpop.eup %1197 }
 0x156   : > { %v584_v2 = vmul.f32 %v1198_v0, %v467_v61 }
 0x158   : > { %v1623_v3 = vadd.f32 %v584_v2, %v538_v1 }
 0x15a   : > { %634 = vmatmul.f32.gmra.mxu0 %v1623_v3 }
 0x1bf   : > { %v626_v7 = vpop.f32.mrf.mxu0 }
 0x1c0   : > { %v627_v8 = vadd.f32 %v1189_v6, %v626_v7 }
 0x1c2   : > { %v638_v9 = vmax.f32 %v627_v8, 0.0 }
 0x1c4   : > { %678 = vmatmul.f32.vlgmr.msrb.gmra.mxu1 %v638_v9 }
 0x1c7   : > { %v629_v10 = vpop.f32.mrf.mxu0 }
 0x1c8   : > { %v630_v11 = vadd.f32 %v1189_v6, %v629_v10 }
 0x1ca   : > { %v639_v12 = vmax.f32 %v630_v11, 0.0 }
 0x1cc   : > { %681 = vmatmul.f32.gmra.mxu1 %v639_v12 }
 0x1cf   : > { %v632_v13 = vpop.f32.mrf.mxu0 }
 0x1d0   : > { %v633_v14 = vadd.f32 %v1189_v6, %v632_v13 }
 0x1d2   : > { %v640_v15 = vmax.f32 %v633_v14, 0.0 }
 0x1d4   : > { %684 = vmatmul.f32.gmra.mxu1 %v640_v15 }
 0x1d7   : > { %v635_v16 = vpop.f32.mrf.mxu0 }
 0x1d8   : > { %v636_v17 = vadd.f32 %v1189_v6, %v635_v16 }
 0x1da   : > { %v641_v18 = vmax.f32 %v636_v17, 0.0 }
 0x1dc   : > { %687 = vmatmul.f32.gmra.mxu1 %v641_v18 }
 0x241   : > { %v679_v22 = vpop.f32.mrf.mxu1 }
 0x242   : > { %v1636_v23 = vadd.f32 %v1190_v21, %v679_v22 }
 0x244   : > { %v866_v25 = vsel %vm1638_vm3, %v1636_v23, -inf  ;;  %v710_v53 = vand.u32 2147483647, %v1636_v23  ;;  %v1103_v54 = vmul.f32 -1.442695, %v1636_v23  ;;  %vm702_vm10 = vcmp.ne.f32.partialorder %v1636_v23, %v1636_v23 }
 0x245   : > { %870 = vmax.xlane.f32.xlu0 %v866_v25 }
 0x246   : > { %v714_v55 = vsub.f32 0.0, %v710_v53 }
 0x248   : > { %v718_v56 = vmul.f32 1.442695, %v714_v55 }
 0x249   : > { %v682_v26 = vpop.f32.mrf.mxu1 }
 0x24a   : > { %v1645_v27 = vadd.f32 %v1190_v21, %v682_v26 }
 0x24c   : > { %v867_v28 = vsel %vm1638_vm3, %v1645_v27, -inf  ;;  %v711_v57 = vand.u32 2147483647, %v1645_v27  ;;  %v1104_v60 = vmul.f32 -1.442695, %v1645_v27  ;;  %v699_v53 = vmax.f32 %v1645_v27, 0.0 }
 0x24d   : > { %872 = vmax.xlane.f32.xlu0 %v867_v28  ;;  %vm703_vm5 = vcmp.ne.f32.partialorder %v1645_v27, %v1645_v27 }
 0x24e   : > { %v715_v61 = vsub.f32 0.0, %v711_v57 }
 0x250   : > { %v720_v0 = vmul.f32 1.442695, %v715_v61 }
 0x251   : > { %v685_v29 = vpop.f32.mrf.mxu1 }
 0x252   : > { %v1650_v30 = vadd.f32 %v1190_v21, %v685_v29 }
 0x254   : > { %v868_v32 = vsel %vm1638_vm3, %v1650_v30, -inf  ;;  %v712_v2 = vand.u32 2147483647, %v1650_v30  ;;  %v1105_v5 = vmul.f32 -1.442695, %v1650_v30  ;;  %v700_v61 = vmax.f32 %v1650_v30, 0.0 }
 0x255   : > { %874 = vmax.xlane.f32.xlu1 %v868_v32 }
 0x256   : > { %v716_v6 = vsub.f32 0.0, %v712_v2 }
 0x258   : > { %v722_v11 = vmul.f32 1.442695, %v716_v6 }
 0x259   : > { %v688_v33 = vpop.f32.mrf.mxu1 }
 0x25a   : > { %v1655_v34 = vadd.f32 %v1190_v21, %v688_v33 }
 0x25c   : > { %v869_v35 = vsel %vm1638_vm3, %v1655_v34, -inf  ;;  %v713_v13 = vand.u32 2147483647, %v1655_v34  ;;  %v1106_v19 = vmul.f32 -1.442695, %v1655_v34 }
 0x25d   : > { %876 = vmax.xlane.f32.xlu1 %v869_v35 }
 0x2b8   : > { %v871_v36 = vpop.xlane.xlu0 %870 }
 0x2b9   : > { %v878_v37 = vsub.f32 %v866_v25, %v871_v36  ;;  %v717_v25 = vsub.f32 0.0, %v713_v13 }
 0x2bb   : > { %v882_v38 = vmul.f32 1.442695, %v878_v37  ;;  %v724_v37 = vmul.f32 1.442695, %v717_v25 }
 0x2bd   : > { %1199 = vpow2.f32 %v882_v38 }
 0x2c0   : > { %v873_v39 = vpop.xlane.xlu0 %872 }
 0x2c1   : > { %v879_v40 = vsub.f32 %v867_v28, %v873_v39 }
 0x2c3   : > { %v1660_v41 = vpop.eup %1199  ;;  %v884_v42 = vmul.f32 1.442695, %v879_v40 }
 0x2c4   : > { %890 = vadd.xlane.f32.xlu2 %v1660_v41 }
 0x2c5   : > { %1201 = vpow2.f32 %v884_v42 }
 0x2c8   : > { %v875_v43 = vpop.xlane.xlu1 %874 }
 0x2c9   : > { %v880_v44 = vsub.f32 %v868_v32, %v875_v43 }
 0x2cb   : > { %v886_v46 = vmul.f32 1.442695, %v880_v44  ;;  %v1663_v47 = vpop.eup %1201 }
 0x2cc   : > { %892 = vadd.xlane.f32.xlu2 %v1663_v47 }
 0x2cd   : > { %1203 = vpow2.f32 %v886_v46 }
 0x2d0   : > { %v877_v48 = vpop.xlane.xlu1 %876 }
 0x2d1   : > { %v881_v49 = vsub.f32 %v869_v35, %v877_v48  ;;  %v698_v35 = vmax.f32 %v1636_v23, 0.0 }
 0x2d3   : > { %v1666_v50 = vpop.eup %1203  ;;  %v888_v51 = vmul.f32 1.442695, %v881_v49 }
 0x2d4   : > { %894 = vadd.xlane.f32.xlu0 %v1666_v50 }
 0x2d5   : > { %1205 = vpow2.f32 %v888_v51 }
 0x2d6   : > { %1207 = vpow2.f32 %v1103_v54 }
 0x2d7   : > { %1209 = vpow2.f32 %v718_v56 }
 0x2d8   : > { %1211 = vpow2.f32 %v1104_v60 }
 0x2db   : > { %v1669_v52 = vpop.eup %1205 }
 0x2dc   : > { %896 = vadd.xlane.f32.xlu1 %v1669_v52  ;;  %v1208_v58 = vpop.eup %1207 }
 0x2dd   : > { %v1676_v62 = vadd.f32 1.0, %v1208_v58  ;;  %v1210_v63 = vpop.eup %1209 }
 0x2de   : > { %v726_v1 = vadd.f32 1.0, %v1210_v63  ;;  %v1212_v4 = vpop.eup %1211  ;;  %v729_v9 = vmul.f32 -0.5, %v1210_v63  ;;  %v732_v18 = vand.u32 2147483647, %v1210_v63 }
 0x2df   : > { %1213 = vrcp.f32 %v1676_v62  ;;  %v1683_v8 = vadd.f32 1.0, %v1212_v4  ;;  %v804_v40 = vand.u32 2147483647, %v1676_v62  ;;  %v806_v44 = vand.u32 2147483648, %v1676_v62 }
 0x2e0   : > { %1215 = vpow2.f32 %v720_v0  ;;  %v730_v15 = vadd.f32 1.0, %v729_v9  ;;  %vm1699_vm6 = vcmp.lt.f32.partialorder %v732_v18, 0.0004427343  ;;  %vm800_vm13 = vweird.f32 %v1676_v62 }
 0x2e1   : > { %1217 = vlog2.f32 %v726_v1  ;;  %v821_v54 = vand.u32 2147483648, %v1683_v8  ;;  %vm1734_vm14 = vcmp.eq.f32.partialorder %v804_v40, 8.507059e+37  ;;  %v807_v0 = vor.u32 1.1754944e-38, %v806_v44 }
 0x2e2   : > { %1219 = vpow2.f32 %v1105_v5  ;;  %v731_v28 = vmul.f32 %v1210_v63, %v730_v15  ;;  %v819_v2 = vand.u32 2147483647, %v1683_v8  ;;  %vm815_vm2 = vweird.f32 %v1683_v8 }
 0x2e3   : > { %1221 = vrcp.f32 %v1683_v8  ;;  %v1768_v15 = vor.u32 1.1754944e-38, %v821_v54 }
 0x2e4   : > { %1223 = vpow2.f32 %v722_v11  ;;  %vm1805_vm8 = vcmp.eq.f32.partialorder %v819_v2, 8.507059e+37 }
 0x2e5   : > { %v1681_v7 = vpop.eup %1213 }
 0x2e6   : > { %v1685_v10 = vpop.eup %1215  ;;  %v796_v12 = vmul.f32 %v1681_v7, %v1676_v62  ;;  %vm801_vm11 = vweird.f32 %v1681_v7 }
 0x2e7   : > { %v1218_v14 = vpop.eup %1217  ;;  %v735_v16 = vadd.f32 1.0, %v1685_v10  ;;  %v738_v42 = vmul.f32 -0.5, %v1685_v10  ;;  %v741_v46 = vand.u32 2147483647, %v1685_v10  ;;  %vm1739_vm15 = vmor %vm800_vm13, %vm801_vm11 }
 0x2e8   : > { %v1220_v17 = vpop.eup %1219  ;;  %v797_v21 = vsub.f32 1.0, %v796_v12  ;;  %v728_v22 = vmul.f32 0.6931472, %v1218_v14 }
 0x2e9   : > { %v1694_v26 = vpop.eup %1221  ;;  %v1696_v29 = vadd.f32 1.0, %v1220_v17  ;;  %1225 = vlog2.f32 %v735_v16  ;;  %v739_v58 = vadd.f32 1.0, %v738_v42  ;;  %vm1743_vm0 = vcmp.lt.f32.partialorder %v741_v46, 0.0004427343 }
 0x2ea   : > { %1227 = vpow2.f32 %v1106_v19  ;;  %v798_v33 = vmul.f32 %v1681_v7, %v797_v21  ;;  %v734_v36 = vsel %vm1699_vm6, %v731_v28, %v728_v22  ;;  %v1711_v39 = vpop.eup %1223  ;;  %v811_v43 = vmul.f32 %v1694_v26, %v1683_v8 }
 0x2eb   : > { %v762_v48 = vadd.f32 %v734_v36, %v698_v35  ;;  %v744_v55 = vadd.f32 1.0, %v1711_v39  ;;  %v747_v11 = vmul.f32 -0.5, %v1711_v39  ;;  %v740_v17 = vmul.f32 %v1685_v10, %v739_v58 }
 0x2ec   : > { %v799_v49 = vadd.f32 %v1681_v7, %v798_v33  ;;  %v812_v60 = vsub.f32 1.0, %v811_v43  ;;  %v750_v18 = vand.u32 2147483647, %v1711_v39  ;;  %vm816_vm6 = vweird.f32 %v1694_v26 }
 0x2ed   : > { %v766_v5 = vsel %vm702_vm10, %v1636_v23, %v762_v48  ;;  %v748_v33 = vadd.f32 1.0, %v747_v11  ;;  %vm1826_vm13 = vmor %vm815_vm2, %vm816_vm6  ;;  %vm704_vm2 = vcmp.ne.f32.partialorder %v1650_v30, %v1650_v30 }
 0x2ee   : > { %v803_v6 = vsel %vm1739_vm15, %v1681_v7, %v799_v49  ;;  %v813_v7 = vmul.f32 %v1694_v26, %v812_v60  ;;  %v772_v10 = vsel %vm1750_vm1, %v766_v5, %v1636_v23  ;;  %vm1809_vm9 = vcmp.lt.f32.partialorder %v750_v18, 0.0004427343 }
 0x2ef   : > { %v1226_v51 = vpop.eup %1225  ;;  %v808_v22 = vsel %vm1734_vm14, %v807_v0, %v803_v6  ;;  %v834_v49 = vand.u32 2147483647, %v1696_v29  ;;  %v749_v57 = vmul.f32 %v1711_v39, %v748_v33  ;;  %vm962_vm14 = vcmp.lt.s32.totalorder %v1629_v20, 16 }
 0x2f0   : > { %v1228_v56 = vpop.eup %1227  ;;  %v737_v9 = vmul.f32 0.6931472, %v1226_v51  ;;  %v814_v40 = vadd.f32 %v1694_v26, %v813_v7  ;;  %v836_v51 = vand.u32 2147483648, %v1696_v29  ;;  %vm830_vm15 = vweird.f32 %v1696_v29 }
 0x2f1   : > { %v1765_v13 = vadd.f32 1.0, %v1228_v56 }
 0x2f2   : > { %v743_v32 = vsel %vm1743_vm0, %v740_v17, %v737_v9  ;;  %v837_v18 = vor.u32 1.1754944e-38, %v836_v51 }
 0x2f3   : > { %v763_v56 = vadd.f32 %v743_v32, %v699_v53  ;;  %v818_v53 = vsel %vm1826_vm13, %v1694_v26, %v814_v40  ;;  %vm835_vm13 = vcmp.eq.f32.partialorder %v834_v49, 8.507059e+37 }
 0x2f5   : > { %v767_v5 = vsel %vm703_vm5, %v1645_v27, %v763_v56 }
 0x337   : > { %v1709_v38 = vpop.xlane.xlu2 %890 }
 0x338   : > { %1229 = vrcp.f32 %v1709_v38  ;;  %v909_v28 = vand.u32 2147483648, %v1709_v38  ;;  %v907_v36 = vand.u32 2147483647, %v1709_v38  ;;  %vm903_vm10 = vweird.f32 %v1709_v38 }
 0x339   : > { %1231 = vrcp.f32 %v1696_v29 }
 0x33a   : > { %1233 = vpow2.f32 %v724_v37  ;;  %v857_v37 = vsel %vm1782_vm4, %v808_v22, %v772_v10  ;;  %vm908_vm12 = vcmp.eq.f32.partialorder %v907_v36, 8.507059e+37 }
 0x33b   : > { %1235 = vlog2.f32 %v744_v55  ;;  %v910_v55 = vor.u32 1.1754944e-38, %v909_v28 }
 0x33e   : > { %v1230_v62 = vpop.eup %1229 }
 0x33f   : > { %v1763_v12 = vpop.eup %1231  ;;  %v899_v14 = vmul.f32 %v1230_v62, %v1709_v38  ;;  %v1770_v16 = vpop.xlane.xlu2 %892  ;;  %vm904_vm7 = vweird.f32 %v1230_v62 }
 0x340   : > { %1237 = vrcp.f32 %v1770_v16  ;;  %v1776_v19 = vpop.eup %1233  ;;  %v826_v35 = vmul.f32 %v1763_v12, %v1696_v29  ;;  %vm905_vm11 = vmor %vm903_vm10, %vm904_vm7  ;;  %vm831_vm0 = vweird.f32 %v1763_v12  ;;  %v924_v26 = vand.u32 2147483648, %v1770_v16 }
 0x341   : > { %v900_v25 = vsub.f32 1.0, %v899_v14  ;;  %1239 = vrcp.f32 %v1765_v13  ;;  %v753_v44 = vadd.f32 1.0, %v1776_v19  ;;  %v1236_v46 = vpop.eup %1235  ;;  %v756_v9 = vmul.f32 -0.5, %v1776_v19 }
 0x342   : > { %v827_v58 = vsub.f32 1.0, %v826_v35  ;;  %v746_v1 = vmul.f32 0.6931472, %v1236_v46  ;;  %v922_v14 = vand.u32 2147483647, %v1770_v16  ;;  %vm918_vm5 = vweird.f32 %v1770_v16 }
 0x343   : > { %v901_v23 = vmul.f32 %v1230_v62, %v900_v25  ;;  %v773_v25 = vsel %vm1750_vm1, %v767_v5, %v1645_v27  ;;  %v925_v33 = vor.u32 1.1754944e-38, %v924_v26  ;;  %v759_v36 = vand.u32 2147483647, %v1776_v19 }
 0x344   : > { %v828_v6 = vmul.f32 %v1763_v12, %v827_v58  ;;  %v752_v7 = vsel %vm1809_vm9, %v749_v57, %v746_v1  ;;  %vm923_vm9 = vcmp.eq.f32.partialorder %v922_v14, 8.507059e+37 }
 0x345   : > { %v902_v48 = vadd.f32 %v1230_v62, %v901_v23  ;;  %v757_v23 = vadd.f32 1.0, %v756_v9  ;;  %v764_v27 = vadd.f32 %v752_v7, %v700_v61 }
 0x346   : > { %v1238_v54 = vpop.eup %1237  ;;  %v829_v40 = vadd.f32 %v1763_v12, %v828_v6 }
 0x347   : > { %v1818_v60 = vpop.xlane.xlu0 %894  ;;  %v906_v63 = vsel %vm905_vm11, %v1230_v62, %v902_v48  ;;  %v914_v0 = vmul.f32 %v1238_v54, %v1770_v16  ;;  %v1835_v2 = vpop.eup %1239  ;;  %vm919_vm6 = vweird.f32 %v1238_v54  ;;  %vm1891_vm11 = vcmp.lt.f32.partialorder %v759_v36, 0.0004427343 }
 0x348   : > { %1241 = vrcp.f32 %v1818_v60  ;;  %v911_v39 = vsel %vm908_vm12, %v910_v55, %v906_v63  ;;  %v841_v10 = vmul.f32 %v1835_v2, %v1765_v13  ;;  %vm920_vm7 = vmor %vm918_vm5, %vm919_vm6  ;;  %v939_v48 = vand.u32 2147483648, %v1818_v60 }
 0x349   : > { %1243 = vlog2.f32 %v753_v44  ;;  %v912_v8 = vmul.f32 %v1660_v41, %v911_v39  ;;  %v915_v62 = vsub.f32 1.0, %v914_v0  ;;  %v937_v55 = vand.u32 2147483647, %v1818_v60 }
 0x34a   : > { %v842_v16 = vsub.f32 1.0, %v841_v10  ;;  %v768_v57 = vsel %vm704_vm2, %v1650_v30, %v764_v27  ;;  %v758_v63 = vmul.f32 %v1776_v19, %v757_v23  ;;  %vm933_vm12 = vweird.f32 %v1818_v60 }
 0x34b   : > { %v958_v41 = vsel %vm1638_vm3, %v912_v8, %v857_v37  ;;  %v916_v11 = vmul.f32 %v1238_v54, %v915_v62  ;;  %v940_v1 = vor.u32 1.1754944e-38, %v939_v48  ;;  %vm846_vm2 = vweird.f32 %v1835_v2 }
 0x34c   : > { %v965_v17 = vsel %vm962_vm14, %v1608_v31, %v958_v41  ;;  %v823_v31 = vsel %vm1805_vm8, %v1768_v15, %v818_v53  ;;  %vm1886_vm8 = vmor %vm830_vm15, %vm831_vm0  ;;  %v843_v39 = vmul.f32 %v1835_v2, %v842_v16  ;;  %v701_v53 = vmax.f32 %v1655_v34, 0.0 }
 0x34d   : > { %969 = vst [vmem:[%s1860_s27] sm:$0xff] %v965_v17  ;;  %v917_v28 = vadd.f32 %v1238_v54, %v916_v11  ;;  %v858_v44 = vsel %vm1782_vm4, %v823_v31, %v773_v25  ;;  %v833_v58 = vsel %vm1886_vm8, %v1763_v12, %v829_v40  ;;  %vm938_vm0 = vcmp.eq.f32.partialorder %v937_v55, 8.507059e+37 }
 0x34e   : > { %v1242_v22 = vpop.eup %1241  ;;  %v844_v26 = vadd.f32 %v1835_v2, %v843_v39  ;;  %vm705_vm6 = vcmp.ne.f32.partialorder %v1655_v34, %v1655_v34  ;;  %vm845_vm5 = vweird.f32 %v1765_v13 }
 0x34f   : > { %v1244_v32 = vpop.eup %1243  ;;  %v929_v35 = vmul.f32 %v1242_v22, %v1818_v60  ;;  %v921_v37 = vsel %vm920_vm7, %v1238_v54, %v917_v28  ;;  %v1875_v42 = vpop.xlane.xlu1 %896  ;;  %vm934_vm10 = vweird.f32 %v1242_v22  ;;  %v838_v60 = vsel %vm835_vm13, %v837_v18, %v833_v58  ;;  %vm1937_vm7 = vmor %vm845_vm5, %vm846_vm2 }
 0x350   : > { %v926_v15 = vsel %vm923_vm9, %v925_v33, %v921_v37  ;;  %1245 = vrcp.f32 %v1875_v42  ;;  %v755_v51 = vmul.f32 0.6931472, %v1244_v32  ;;  %vm935_vm15 = vmor %vm933_vm12, %vm934_vm10  ;;  %v954_v11 = vand.u32 2147483648, %v1875_v42 }
 0x351   : > { %v930_v43 = vsub.f32 1.0, %v929_v35  ;;  %v927_v46 = vmul.f32 %v1663_v47, %v926_v15  ;;  %v952_v18 = vand.u32 2147483647, %v1875_v42  ;;  %vm948_vm8 = vweird.f32 %v1875_v42 }
 0x352   : > { %v761_v12 = vsel %vm1891_vm11, %v758_v63, %v755_v51  ;;  %v955_v25 = vor.u32 1.1754944e-38, %v954_v11 }
 0x353   : > { %v931_v54 = vmul.f32 %v1242_v22, %v930_v43  ;;  %v959_v47 = vsel %vm1638_vm3, %v927_v46, %v858_v44  ;;  %v765_v49 = vadd.f32 %v761_v12, %v701_v53  ;;  %vm953_vm12 = vcmp.eq.f32.partialorder %v952_v18, 8.507059e+37 }
 0x354   : > { %v966_v38 = vsel %vm962_vm14, %v1613_v45, %v959_v47  ;;  %v774_v45 = vsel %vm1750_vm1, %v768_v57, %v1650_v30  ;;  %v851_v30 = vand.u32 2147483648, %v1765_v13 }
 0x355   : > { %v932_v0 = vadd.f32 %v1242_v22, %v931_v54  ;;  %970 = vst [vmem:[%s1860_s27 + $0x8] sm:$0xff] %v966_v38  ;;  %v859_v6 = vsel %vm1782_vm4, %v838_v60, %v774_v45  ;;  %v769_v10 = vsel %vm705_vm6, %v1655_v34, %v765_v49 }
 0x356   : > { %v1246_v19 = vpop.eup %1245  ;;  %v775_v31 = vsel %vm1750_vm1, %v769_v10, %v1655_v34 }
 0x357   : > { %v936_v8 = vsel %vm935_vm15, %v1242_v22, %v932_v0  ;;  %v944_v5 = vmul.f32 %v1246_v19, %v1875_v42  ;;  %vm949_vm9 = vweird.f32 %v1246_v19 }
 0x358   : > { %v941_v62 = vsel %vm938_vm0, %v940_v1, %v936_v8  ;;  %vm950_vm11 = vmor %vm948_vm8, %vm949_vm9 }
 0x359   : > { %v942_v29 = vmul.f32 %v1666_v50, %v941_v62  ;;  %v945_v9 = vsub.f32 1.0, %v944_v5  ;;  %v849_v50 = vand.u32 2147483647, %v1765_v13  ;;  %v848_v13 = vsel %vm1937_vm7, %v1835_v2, %v844_v26 }
 0x35b   : > { %v960_v41 = vsel %vm1638_vm3, %v942_v29, %v859_v6  ;;  %v946_v7 = vmul.f32 %v1246_v19, %v945_v9  ;;  %vm850_vm10 = vcmp.eq.f32.partialorder %v849_v50, 8.507059e+37 }
 0x35c   : > { %v967_v14 = vsel %vm962_vm14, %v1618_v59, %v960_v41  ;;  %v852_v59 = vor.u32 1.1754944e-38, %v851_v30 }
 0x35d   : > { %971 = vst [vmem:[%s1860_s27 + $0x10] sm:$0xff] %v967_v14  ;;  %v947_v22 = vadd.f32 %v1246_v19, %v946_v7 }
 0x35e   : > { %v853_v28 = vsel %vm850_vm10, %v852_v59, %v848_v13 }
 0x35f   : > { %v951_v32 = vsel %vm950_vm11, %v1246_v19, %v947_v22  ;;  %v860_v35 = vsel %vm1782_vm4, %v853_v28, %v775_v31 }
 0x360   : > { %v956_v2 = vsel %vm953_vm12, %v955_v25, %v951_v32 }
 0x361   : > { %v957_v33 = vmul.f32 %v1669_v52, %v956_v2 }
 0x363   : > { %v961_v23 = vsel %vm1638_vm3, %v957_v33, %v860_v35 }
 0x364   : > { %v968_v34 = vsel %vm962_vm14, %v1623_v3, %v961_v23 }
 0x365   : > { %972 = vst [vmem:[%s1860_s27 + $0x18] sm:$0xff] %v968_v34 }
 0x366   : > { %1364 = shalt.err (!%p1361_p8)
}
 0x367   : > { %s1416_s24 = smov 128   ;;  %s1417_s26 = smov 8  }
 0x368   : > { %1125 = dma.vmem_to_hbm [thread:$0]  (%p1506_p5), %s987_s22, 512, %s989_s23, %s974_s25, %s1416_s24, %s1416_s24, %s1417_s26  }
 0x369 PF: > { %p1147_p9 = scmp.ge.s32.totalorder %s1407_s12, 2  ;;  %s1003_s27 = sand.u32 1, %s1395_s30  }
 0x36a   : > { %s1004_s14 = scalar_lea.sflag [#allocation4], %s1003_s27 }
 0x36b   : > { %p1138_p10 = pnand %p1147_p9, %p1510_p6 }
 0x36d   : > { %p1139_p11 = pneg %p1138_p10 }
 0x36f   : > { %1390 = dma.done.wait (%p1139_p11), %s1004_s14, 512  }
 0x370   : > { %1392 = vsyncadd (%p1139_p11), %s1004_s14, 4294966784  ;;  %s2040_s13 = sld [smem:[#allocation12_spill]]  ;;  %p21_p12 = scmp.ge.s32.totalorder %s1493_s15, 4  }
 0x371   : > { %s2041_s11 = sld [smem:[#allocation13_spill]]  ;;  %s2042_s30 = smov %s1399_s10 }
 0x372   : > { %s2044_s12 = smov %s1493_s15  ;;  %23 = sbr.rel (!%p21_p12) target bundleno = 8 (0x8), region = 104 }
 0x376   : > { %s2043_s10 = smov %s2040_s13 }
 0x377   :  { %1010 = vsyncpa [#allocation3], 1 }
 0x378   :  { %1012 = vsyncpa [#allocation3 + $0x1], 1 }
 0x379   :  { %1013 = vsyncpa [#allocation6], 1 }
 0x37a   :  { %1014 = vsyncpa [#allocation4], 1 }
 0x37b   :  { %1016 = vsyncpa [#allocation4 + $0x1], 1 }

</bundles_post_ra>
